<compile_context>
chip_gen: v7x
topology: tpu7x:2x2x1
jax: 0.10.0
libtpu: 0.0.40
codegen_flags: <defaults>
</compile_context>

<pallas_src>
import functools

import jax
import jax.numpy as jnp
from jax.experimental import pallas as pl
from jax.experimental.pallas import tpu as pltpu

IN_DIM = 784    # fc1 in_features
HID_DIM = 392   # fc1 out_features / fc2 in_features
OUT_DIM = 10    # fc2 out_features
OUT_PAD = 128   # lane-dense output width (extra zero columns sliced off in wrapper)


def _round_up(x, m):
    return (x + m - 1) // m * m


def mlp_kernel(x_ref, w1_ref, b1_ref, w2_ref, b2_ref, o_ref):
    # fc1: cast x to bf16 in-kernel; (tb, 784)bf16 @ (784, 392)bf16 -> f32 acc on MXU.
    x = x_ref[...].astype(jnp.bfloat16)
    h = jnp.dot(x, w1_ref[...], preferred_element_type=jnp.float32)
    h = jnp.maximum(h + b1_ref[...], 0.0)            # bias + ReLU in f32 on the VPU
    # fc2: (tb, 392)bf16 @ (392, 128)bf16 -> f32 acc; lane-dense 128-wide output.
    y = jnp.dot(h.astype(jnp.bfloat16), w2_ref[...],
                preferred_element_type=jnp.float32)
    o_ref[...] = (y + b2_ref[...]).astype(o_ref.dtype)


def _default_block_b():
    # v5e: a 256-row step is already ~1.4us of MXU time (MXU-bound) -> keep 256.
    # v6e/v7x: 512 rows amortizes the ~0.35us per-grid-step pipeline overhead.
    try:
        kind = jax.devices()[0].device_kind.lower()
        if "v5" in kind:
            return 256
    except Exception:
        pass
    return 512


@functools.partial(jax.jit, static_argnames=("block_b",))
def net_forward(x, w1p, b1p, w2p, b2p, *, block_b=None):
    """x: (B, 784) f32 (unpadded).  w*/b*: params from pad_params().  Returns (B, 10) f32."""
    if block_b is None:
        block_b = _default_block_b()
    B = x.shape[0]

    # Batch tile: multiple of 16 (bf16 packs 16 rows per vreg), capped at block_b.
    tb = min(block_b, _round_up(B, 16))
    # Keep >=2 grid steps for big batches so the "parallel" axis shards across
    # v7x's 2 TensorCores (no effect on tiny batches / single-core chips).
    while pl.cdiv(B, tb) < 2 and tb >= 256:
        tb = _round_up(tb // 2, 16)

    num_tiles = pl.cdiv(B, tb)
    b_pad = num_tiles * tb  # output rows; last x tile may be partial (rows >= B are
                            # unspecified and their output rows are sliced off below)

    cost = pl.CostEstimate(
        flops=2 * b_pad * (IN_DIM * HID_DIM + HID_DIM * OUT_PAD),
        transcendentals=0,
        bytes_accessed=(x.size * 4 + w1p.size * 2 + w2p.size * 2
                        + b1p.size * 4 + b2p.size * 4 + b_pad * OUT_PAD * 4),
    )

    out = pl.pallas_call(
        mlp_kernel,
        out_shape=jax.ShapeDtypeStruct((b_pad, OUT_PAD), jnp.float32),
        grid_spec=pltpu.PrefetchScalarGridSpec(
            num_scalar_prefetch=0,
            grid=(num_tiles,),
            in_specs=[
                # x tiles move with the grid step -> double-buffered DMA.  Last block
                # dim (784) equals the full array dim -> exempt from 128-divisibility.
                pl.BlockSpec((tb, IN_DIM), lambda i: (i, 0)),
                # Weights / biases: constant block index -> resident in VMEM (no
                # re-DMA across grid steps).  Kept unpadded (full-array blocks).
                pl.BlockSpec((IN_DIM, HID_DIM), lambda i: (0, 0)),
                pl.BlockSpec((1, HID_DIM), lambda i: (0, 0)),
                pl.BlockSpec((HID_DIM, OUT_PAD), lambda i: (0, 0)),
                pl.BlockSpec((1, OUT_PAD), lambda i: (0, 0)),
            ],
            out_specs=pl.BlockSpec((tb, OUT_PAD), lambda i: (i, 0)),
        ),
        compiler_params=pltpu.CompilerParams(
            # Independent batch tiles -> megacore sharding on v7x.
            dimension_semantics=("parallel",),
            vmem_limit_bytes=16 * 1024 * 1024,  # kernel needs ~7-8 MiB at tb=512
        ),
        cost_estimate=cost,
    )(x, w1p, b1p, w2p, b2p)

    # Drop any padded batch rows and the 118 zero output columns.
    return out[:B, :OUT_DIM]


def init_params(key):
    # Deterministic synthetic parameters (shapes match nn.Linear(784,392)/(392,10)),
    # stored as (in, out) so the kernel computes y = x @ W + b.
    k1, k2, k3, k4 = jax.random.split(key, 4)
    w1 = jax.random.normal(k1, (IN_DIM, HID_DIM), jnp.float32) * 0.02
    b1 = jax.random.normal(k2, (1, HID_DIM), jnp.float32) * 0.02
    w2 = jax.random.normal(k3, (HID_DIM, OUT_DIM), jnp.float32) * 0.02
    b2 = jax.random.normal(k4, (1, OUT_DIM), jnp.float32) * 0.02
    return w1, b1, w2, b2


def pad_params(w1, b1, w2, b2):
    """One-time weight re-layout: bf16 matmul operands; only w2/b2's output dim is
    zero-padded to 128 lanes so the kernel's output store is lane-dense."""
    w1p = w1.astype(jnp.bfloat16)                                   # (784, 392) bf16
    b1p = b1.reshape(1, HID_DIM).astype(jnp.float32)                # (1, 392) f32
    w2p = jnp.zeros((HID_DIM, OUT_PAD), jnp.bfloat16).at[:, :OUT_DIM].set(
        w2.astype(jnp.bfloat16))                                    # (392, 128) bf16
    b2p = jnp.zeros((1, OUT_PAD), jnp.float32).at[:, :OUT_DIM].set(
        b2.reshape(1, OUT_DIM))                                     # (1, 128) f32
    return w1p, b1p, w2p, b2p


if __name__ == "__main__":
    key = jax.random.PRNGKey(0)
    kx, kp = jax.random.split(key)
    B = 16
    x = jax.random.normal(kx, (B, IN_DIM), jnp.float32)
    w1, b1, w2, b2 = init_params(kp)
    w1p, b1p, w2p, b2p = pad_params(w1, b1, w2, b2)

    out = net_forward(x, w1p, b1p, w2p, b2p)
    out = jax.block_until_ready(out)

    # Reference in plain f32 JAX (same math as the PyTorch module); loose tolerance
    # accounts for bf16 matmul operands (f32 accumulation).
    ref = jnp.maximum(x @ w1 + b1, 0.0) @ w2 + b2
    assert out.shape == (B, OUT_DIM)
    err = float(jnp.max(jnp.abs(out - ref)))
    assert jnp.allclose(out, ref, atol=2e-2, rtol=2e-2), err

    print("KERNEL_OK")
</pallas_src>

<mosaic_0001>
module attributes {stable_mosaic.version = 11 : i64} {
  func.func @mlp_kernel(%arg0: i32, %arg1: memref<16x784xf32, #tpu.memory_space<vmem>>, %arg2: memref<784x392xbf16, #tpu.memory_space<vmem>>, %arg3: memref<1x392xf32, #tpu.memory_space<vmem>>, %arg4: memref<392x128xbf16, #tpu.memory_space<vmem>>, %arg5: memref<1x128xf32, #tpu.memory_space<vmem>>, %arg6: memref<16x128xf32, #tpu.memory_space<vmem>>) attributes {dimension_semantics = [#tpu.dimension_semantics<parallel>], iteration_bounds = array<i64: 1>, scalar_prefetch = 0 : i64, scratch_operands = 0 : i64, tpu.core_type = #tpu.core_type<tc>, window_params = [{transform_indices = @transform_0, window_bounds = array<i64: 16, 784>}, {pipeline_mode = #tpu.pipeline_mode<synchronous>, transform_indices = @transform_1, window_bounds = array<i64: 784, 392>}, {pipeline_mode = #tpu.pipeline_mode<synchronous>, transform_indices = @transform_2, window_bounds = array<i64: 1, 392>}, {pipeline_mode = #tpu.pipeline_mode<synchronous>, transform_indices = @transform_3, window_bounds = array<i64: 392, 128>}, {pipeline_mode = #tpu.pipeline_mode<synchronous>, transform_indices = @transform_4, window_bounds = array<i64: 1, 128>}, {transform_indices = @transform_5, window_bounds = array<i64: 16, 128>}]} {
    %c0 = arith.constant 0 : index
    %c0_0 = arith.constant 0 : index
    %0 = vector.load %arg1[%c0, %c0_0] : memref<16x784xf32, #tpu.memory_space<vmem>>, vector<16x784xf32>
    %1 = arith.truncf %0 : vector<16x784xf32> to vector<16x784xbf16>
    %c0_1 = arith.constant 0 : index
    %c0_2 = arith.constant 0 : index
    %2 = vector.load %arg2[%c0_1, %c0_2] : memref<784x392xbf16, #tpu.memory_space<vmem>>, vector<784x392xbf16>
    %cst = arith.constant dense<0.000000e+00> : vector<16x392xf32>
    %3 = tpu.matmul %1, %2, %cst {dimension_numbers = #tpu.dot_dimension_numbers<[1], [0], [0], [1], [0, 0, 1, 1], [], []>} : vector<16x784xbf16>, vector<784x392xbf16>, vector<16x392xf32> -> vector<16x392xf32>
    %c0_3 = arith.constant 0 : index
    %c0_4 = arith.constant 0 : index
    %4 = vector.load %arg3[%c0_3, %c0_4] : memref<1x392xf32, #tpu.memory_space<vmem>>, vector<1x392xf32>
    %5 = vector.broadcast %4 : vector<1x392xf32> to vector<16x392xf32>
    %6 = arith.addf %3, %5 : vector<16x392xf32>
    %cst_5 = arith.constant 0.000000e+00 : f32
    %7 = vector.broadcast %cst_5 : f32 to vector<16x392xf32>
    %8 = arith.maximumf %6, %7 : vector<16x392xf32>
    %9 = arith.truncf %8 : vector<16x392xf32> to vector<16x392xbf16>
    %c0_6 = arith.constant 0 : index
    %c0_7 = arith.constant 0 : index
    %10 = vector.load %arg4[%c0_6, %c0_7] : memref<392x128xbf16, #tpu.memory_space<vmem>>, vector<392x128xbf16>
    %cst_8 = arith.constant dense<0.000000e+00> : vector<16x128xf32>
    %11 = tpu.matmul %9, %10, %cst_8 {dimension_numbers = #tpu.dot_dimension_numbers<[1], [0], [0], [1], [0, 0, 1, 1], [], []>} : vector<16x392xbf16>, vector<392x128xbf16>, vector<16x128xf32> -> vector<16x128xf32>
    %c0_9 = arith.constant 0 : index
    %c0_10 = arith.constant 0 : index
    %12 = vector.load %arg5[%c0_9, %c0_10] : memref<1x128xf32, #tpu.memory_space<vmem>>, vector<1x128xf32>
    %13 = vector.broadcast %12 : vector<1x128xf32> to vector<16x128xf32>
    %14 = arith.addf %11, %13 : vector<16x128xf32>
    %c0_11 = arith.constant 0 : index
    %c0_12 = arith.constant 0 : index
    %15 = vector.load %arg6[%c0_11, %c0_12] : memref<16x128xf32, #tpu.memory_space<vmem>>, vector<16x128xf32>
    tpu.vector_store %arg6[%c0_11, %c0_12], %14 {strides = array<i32>} : memref<16x128xf32, #tpu.memory_space<vmem>>, vector<16x128xf32>,
    return
  }
  func.func @transform_0(%arg0: i32) -> (i32, i32) {
    %c0_i32 = arith.constant 0 : i32
    %c0_i32_0 = arith.constant 0 : i32
    return %arg0, %c0_i32 : i32, i32
  }
  func.func @transform_1(%arg0: i32) -> (i32, i32) {
    %c0_i32 = arith.constant 0 : i32
    %c0_i32_0 = arith.constant 0 : i32
    %c0_i32_1 = arith.constant 0 : i32
    return %c0_i32, %c0_i32_0 : i32, i32
  }
  func.func @transform_2(%arg0: i32) -> (i32, i32) {
    %c0_i32 = arith.constant 0 : i32
    %c0_i32_0 = arith.constant 0 : i32
    %c0_i32_1 = arith.constant 0 : i32
    return %c0_i32, %c0_i32_0 : i32, i32
  }
  func.func @transform_3(%arg0: i32) -> (i32, i32) {
    %c0_i32 = arith.constant 0 : i32
    %c0_i32_0 = arith.constant 0 : i32
    %c0_i32_1 = arith.constant 0 : i32
    return %c0_i32, %c0_i32_0 : i32, i32
  }
  func.func @transform_4(%arg0: i32) -> (i32, i32) {
    %c0_i32 = arith.constant 0 : i32
    %c0_i32_0 = arith.constant 0 : i32
    %c0_i32_1 = arith.constant 0 : i32
    return %c0_i32, %c0_i32_0 : i32, i32
  }
  func.func @transform_5(%arg0: i32) -> (i32, i32) {
    %c0_i32 = arith.constant 0 : i32
    %c0_i32_0 = arith.constant 0 : i32
    return %arg0, %c0_i32 : i32, i32
  }
}

</mosaic_0001>

<bundles_post_ra>
// kernel: net_forward.1
= control target key start
LH: loop header
LB: loop body
LE: loop exit
PB: predicated region body
PF: predicated region fallthrough
CT: control target
= control target key end

     0   :  { %s3295_s0 = inlined_call_operand.vmem [shape: f32[16,784], index: 0, kind: input, shape index: {}]   ;;  %s3296_s1 = inlined_call_operand.vmem [shape: bf16[784,392], index: 1, kind: input, shape index: {}]   ;;  %s3297_s2 = inlined_call_operand.vmem [shape: f32[1,392], index: 2, kind: input, shape index: {}]   ;;  %s3298_s3 = inlined_call_operand.vmem [shape: bf16[392,128], index: 3, kind: input, shape index: {}]   ;;  %s3299_s4 = inlined_call_operand.vmem [shape: f32[1,128], index: 4, kind: input, shape index: {}]   ;;  %s3300_s5 = inlined_call_operand.hbm [shape: f32[16,128], index: 5, kind: output, shape index: {}]  }
   0x1   :  { %v2195_v0 = vld [vmem:[%s3296_s1 + $0x4] ss:$16 sps:$4 sm:$0xff]   ;;  %v2197_v1 = vld [vmem:[%s3296_s1 + $0xc] ss:$16 sps:$4 sm:$0xff]   ;;  %v2199_v2 = vld [vmem:[%s3296_s1] ss:$16 sps:$4 sm:$0xff]  }
   0x2   :  { %1245 = vmatprep.subr.bf16.mxu0 %v2195_v0  ;;  %v2200_v3 = vld [vmem:[%s3296_s1 + $0x8] ss:$16 sps:$4 sm:$0xff]   ;;  %1417 = vmatprep.subr.bf16.mxu1 %v2197_v1  ;;  %v2201_v4 = vld [vmem:[%s3296_s1 + $0x24] ss:$16 sps:$4 sm:$0xff]   ;;  %v2203_v5 = vld [vmem:[%s3296_s1 + $0x2c] ss:$16 sps:$4 sm:$0xff]  }
   0x3   :  { %1246 = vmatpush1.bf16.msra.mxu0 %v2199_v2  ;;  %1418 = vmatpush1.bf16.msra.mxu1 %v2200_v3  ;;  %v2205_v6 = vld [vmem:[%s3296_s1 + $0x20] ss:$16 sps:$4 sm:$0xff]   ;;  %v2206_v7 = vld [vmem:[%s3296_s1 + $0x28] ss:$16 sps:$4 sm:$0xff]   ;;  %v2207_v8 = vld [vmem:[%s3296_s1 + $0x44] ss:$16 sps:$4 sm:$0xff]  }
   0x4   :  { %1247 = vmatprep.subr.bf16.mxu0 %v2201_v4  ;;  %1419 = vmatprep.subr.bf16.mxu1 %v2203_v5  ;;  %v2209_v9 = vld [vmem:[%s3296_s1 + $0x4c] ss:$16 sps:$4 sm:$0xff]   ;;  %v2211_v10 = vld [vmem:[%s3296_s1 + $0x40] ss:$16 sps:$4 sm:$0xff]   ;;  %v2212_v11 = vld [vmem:[%s3296_s1 + $0x48] ss:$16 sps:$4 sm:$0xff]  }
   0x5   :  { %v2213_v12 = vld [vmem:[%s3296_s1 + $0x64] ss:$16 sps:$4 sm:$0xff]   ;;  %v2215_v13 = vld [vmem:[%s3296_s1 + $0x6c] ss:$16 sps:$4 sm:$0xff]   ;;  %v2217_v14 = vld [vmem:[%s3296_s1 + $0x60] ss:$16 sps:$4 sm:$0xff]  }
   0x6   :  { %v2218_v15 = vld [vmem:[%s3296_s1 + $0x68] ss:$16 sps:$4 sm:$0xff]   ;;  %v2219_v16 = vld [vmem:[%s3296_s1 + $0x84] ss:$16 sps:$4 sm:$0xff]   ;;  %v2221_v17 = vld [vmem:[%s3296_s1 + $0x8c] ss:$16 sps:$4 sm:$0xff]  }
   0x7   :  { %1248 = vmatpush1.bf16.msra.mxu0 %v2205_v6  ;;  %1420 = vmatpush1.bf16.msra.mxu1 %v2206_v7  ;;  %v2223_v18 = vld [vmem:[%s3296_s1 + $0x80] ss:$16 sps:$4 sm:$0xff]   ;;  %v2224_v19 = vld [vmem:[%s3296_s1 + $0x88] ss:$16 sps:$4 sm:$0xff]   ;;  %v2225_v20 = vld [vmem:[%s3296_s1 + $0xa4] ss:$16 sps:$4 sm:$0xff]  }
   0x8   :  { %1249 = vmatprep.subr.bf16.mxu0 %v2207_v8  ;;  %1421 = vmatprep.subr.bf16.mxu1 %v2209_v9  ;;  %v2227_v21 = vld [vmem:[%s3296_s1 + $0xac] ss:$16 sps:$4 sm:$0xff]   ;;  %v2229_v22 = vld [vmem:[%s3296_s1 + $0xa0] ss:$16 sps:$4 sm:$0xff]   ;;  %v2230_v23 = vld [vmem:[%s3296_s1 + $0xa8] ss:$16 sps:$4 sm:$0xff]  }
   0x9   :  { %v2231_v24 = vld [vmem:[%s3296_s1 + $0xc4] ss:$16 sps:$4 sm:$0xff]   ;;  %v2233_v25 = vld [vmem:[%s3296_s1 + $0xcc] ss:$16 sps:$4 sm:$0xff]   ;;  %v2235_v26 = vld [vmem:[%s3296_s1 + $0xc0] ss:$16 sps:$4 sm:$0xff]  }
   0xa   :  { %v2236_v27 = vld [vmem:[%s3296_s1 + $0xc8] ss:$16 sps:$4 sm:$0xff]   ;;  %v2237_v28 = vld [vmem:[%s3296_s1 + $0xe4] ss:$16 sps:$4 sm:$0xff]   ;;  %v2239_v29 = vld [vmem:[%s3296_s1 + $0xec] ss:$16 sps:$4 sm:$0xff]  }
   0xb   :  { %1250 = vmatpush1.bf16.msra.mxu0 %v2211_v10  ;;  %1422 = vmatpush1.bf16.msra.mxu1 %v2212_v11  ;;  %v2241_v30 = vld [vmem:[%s3296_s1 + $0xe0] ss:$16 sps:$4 sm:$0xff]   ;;  %v2242_v31 = vld [vmem:[%s3296_s1 + $0xe8] ss:$16 sps:$4 sm:$0xff]   ;;  %v2243_v32 = vld [vmem:[%s3296_s1 + $0x104] ss:$16 sps:$4 sm:$0xff]  }
   0xc   :  { %1251 = vmatprep.subr.bf16.mxu0 %v2213_v12  ;;  %1423 = vmatprep.subr.bf16.mxu1 %v2215_v13  ;;  %v2245_v33 = vld [vmem:[%s3296_s1 + $0x10c] ss:$16 sps:$4 sm:$0xff]   ;;  %v2247_v34 = vld [vmem:[%s3296_s1 + $0x100] ss:$16 sps:$4 sm:$0xff]   ;;  %v2248_v35 = vld [vmem:[%s3296_s1 + $0x108] ss:$16 sps:$4 sm:$0xff]  }
   0xd   :  { %v2249_v36 = vld [vmem:[%s3296_s1 + $0x124] ss:$16 sps:$4 sm:$0xff]   ;;  %v2251_v37 = vld [vmem:[%s3296_s1 + $0x12c] ss:$16 sps:$4 sm:$0xff]   ;;  %v2253_v38 = vld [vmem:[%s3296_s1 + $0x120] ss:$16 sps:$4 sm:$0xff]  }
   0xe   :  { %v2254_v39 = vld [vmem:[%s3296_s1 + $0x128] ss:$16 sps:$4 sm:$0xff]   ;;  %v2255_v40 = vld [vmem:[%s3296_s1 + $0x144] ss:$16 sps:$4 sm:$0xff]   ;;  %v2257_v41 = vld [vmem:[%s3296_s1 + $0x14c] ss:$16 sps:$4 sm:$0xff]  }
   0xf   :  { %1252 = vmatpush1.bf16.msra.mxu0 %v2217_v14  ;;  %1424 = vmatpush1.bf16.msra.mxu1 %v2218_v15  ;;  %v2259_v42 = vld [vmem:[%s3296_s1 + $0x140] ss:$16 sps:$4 sm:$0xff]   ;;  %v2260_v43 = vld [vmem:[%s3296_s1 + $0x148] ss:$16 sps:$4 sm:$0xff]   ;;  %v2261_v44 = vld [vmem:[%s3296_s1 + $0x164] ss:$16 sps:$4 sm:$0xff]  }
  0x10   :  { %1253 = vmatprep.subr.bf16.mxu0 %v2219_v16  ;;  %1425 = vmatprep.subr.bf16.mxu1 %v2221_v17  ;;  %v2263_v45 = vld [vmem:[%s3296_s1 + $0x16c] ss:$16 sps:$4 sm:$0xff]   ;;  %v30_v47 = vld [vmem:[%s3295_s0 + $0x40] sm:$0xff]  ;;  %v2266_v49 = vld [vmem:[%s3296_s1 + $0x168] ss:$16 sps:$4 sm:$0xff]  }
  0x11   :  { %v23_v46 = vld [vmem:[%s3295_s0 + $0x8] sm:$0xff]  ;;  %v2265_v48 = vld [vmem:[%s3296_s1 + $0x160] ss:$16 sps:$4 sm:$0xff]   ;;  %v2267_v51 = vld [vmem:[%s3296_s1 + $0x184] ss:$16 sps:$4 sm:$0xff]  }
  0x12   :  { %v37_v50 = vpack.c.bf16 %v30_v47, %v23_v46  ;;  %v2269_v52 = vld [vmem:[%s3296_s1 + $0x18c] ss:$16 sps:$4 sm:$0xff]   ;;  %v2271_v53 = vld [vmem:[%s3296_s1 + $0x180] ss:$16 sps:$4 sm:$0xff]   ;;  %v2272_v54 = vld [vmem:[%s3296_s1 + $0x188] ss:$16 sps:$4 sm:$0xff]  }
  0x13   :  { %1254 = vmatpush1.bf16.msra.mxu0 %v2223_v18  ;;  %1426 = vmatpush1.bf16.msra.mxu1 %v2224_v19  ;;  %v2273_v55 = vld [vmem:[%s3296_s1 + $0x1a4] ss:$16 sps:$4 sm:$0xff]   ;;  %v2275_v56 = vld [vmem:[%s3296_s1 + $0x1ac] ss:$16 sps:$4 sm:$0xff]   ;;  %v2277_v57 = vld [vmem:[%s3296_s1 + $0x1a0] ss:$16 sps:$4 sm:$0xff]  }
  0x14   :  { %1255 = vmatprep.subr.bf16.mxu0 %v2225_v20  ;;  %1427 = vmatprep.subr.bf16.mxu1 %v2227_v21  ;;  %v2278_v58 = vld [vmem:[%s3296_s1 + $0x1a8] ss:$16 sps:$4 sm:$0xff]   ;;  %v2279_v59 = vld [vmem:[%s3296_s1 + $0x1c4] ss:$16 sps:$4 sm:$0xff]   ;;  %v2281_v60 = vld [vmem:[%s3296_s1 + $0x1cc] ss:$16 sps:$4 sm:$0xff]  }
  0x15   :  { %1277 = vmatprep.mubr.bf16.mxu0 %v37_v50  ;;  %1449 = vmatprep.mubr.bf16.mxu1 %v37_v50  ;;  %v2283_v61 = vld [vmem:[%s3296_s1 + $0x1c0] ss:$16 sps:$4 sm:$0xff]   ;;  %v2284_v62 = vld [vmem:[%s3296_s1 + $0x1c8] ss:$16 sps:$4 sm:$0xff]   ;;  %v2285_v63 = vld [vmem:[%s3296_s1 + $0x1e4] ss:$16 sps:$4 sm:$0xff]  }
  0x16   :  { %v2287_v0 = vld [vmem:[%s3296_s1 + $0x1ec] ss:$16 sps:$4 sm:$0xff]   ;;  %v2289_v1 = vld [vmem:[%s3296_s1 + $0x1e0] ss:$16 sps:$4 sm:$0xff]   ;;  %v2290_v2 = vld [vmem:[%s3296_s1 + $0x1e8] ss:$16 sps:$4 sm:$0xff]  }
  0x17   :  { %1256 = vmatpush1.bf16.msra.mxu0 %v2229_v22  ;;  %1428 = vmatpush1.bf16.msra.mxu1 %v2230_v23  ;;  %v2293_v3 = vld [vmem:[%s3296_s1 + $0x204] ss:$16 sps:$4 sm:$0xff]   ;;  %v29_v5 = vld [vmem:[%s3295_s0 + $0x38] sm:$0xff]  ;;  %v2291_v7 = vld [vmem:[%s3296_s1 + $0x200] ss:$16 sps:$4 sm:$0xff]  }
  0x18   :  { %1257 = vmatprep.subr.bf16.mxu0 %v2231_v24  ;;  %1429 = vmatprep.subr.bf16.mxu1 %v2233_v25  ;;  %v22_v4 = vld [vmem:[%s3295_s0] sm:$0xff]  ;;  %v2296_v6 = vld [vmem:[%s3296_s1 + $0x20c] ss:$16 sps:$4 sm:$0xff]   ;;  %v2294_v8 = vld [vmem:[%s3296_s1 + $0x208] ss:$16 sps:$4 sm:$0xff]  }
  0x19   :  { %v36_v9 = vpack.c.bf16 %v29_v5, %v22_v4  ;;  %v2299_v10 = vld [vmem:[%s3296_s1 + $0x224] ss:$16 sps:$4 sm:$0xff]   ;;  %v2302_v11 = vld [vmem:[%s3296_s1 + $0x22c] ss:$16 sps:$4 sm:$0xff]   ;;  %v2297_v12 = vld [vmem:[%s3296_s1 + $0x220] ss:$16 sps:$4 sm:$0xff]  }
  0x1a   :  { %v2300_v13 = vld [vmem:[%s3296_s1 + $0x228] ss:$16 sps:$4 sm:$0xff]   ;;  %v2305_v14 = vld [vmem:[%s3296_s1 + $0x244] ss:$16 sps:$4 sm:$0xff]   ;;  %v2308_v15 = vld [vmem:[%s3296_s1 + $0x24c] ss:$16 sps:$4 sm:$0xff]  }
  0x1b   :  { %1258 = vmatpush1.bf16.msra.mxu0 %v2235_v26  ;;  %1430 = vmatpush1.bf16.msra.mxu1 %v2236_v27  ;;  %v2303_v16 = vld [vmem:[%s3296_s1 + $0x240] ss:$16 sps:$4 sm:$0xff]   ;;  %v2306_v17 = vld [vmem:[%s3296_s1 + $0x248] ss:$16 sps:$4 sm:$0xff]   ;;  %v2311_v18 = vld [vmem:[%s3296_s1 + $0x264] ss:$16 sps:$4 sm:$0xff]  }
  0x1c   :  { %1259 = vmatprep.subr.bf16.mxu0 %v2237_v28  ;;  %1431 = vmatprep.subr.bf16.mxu1 %v2239_v29  ;;  %v2314_v19 = vld [vmem:[%s3296_s1 + $0x26c] ss:$16 sps:$4 sm:$0xff]   ;;  %v2309_v20 = vld [vmem:[%s3296_s1 + $0x260] ss:$16 sps:$4 sm:$0xff]   ;;  %v2312_v21 = vld [vmem:[%s3296_s1 + $0x268] ss:$16 sps:$4 sm:$0xff]  }
  0x1d   :  { %v2317_v22 = vld [vmem:[%s3296_s1 + $0x284] ss:$16 sps:$4 sm:$0xff]   ;;  %v2320_v23 = vld [vmem:[%s3296_s1 + $0x28c] ss:$16 sps:$4 sm:$0xff]   ;;  %v2315_v24 = vld [vmem:[%s3296_s1 + $0x280] ss:$16 sps:$4 sm:$0xff]  }
  0x1e   :  { %v2318_v25 = vld [vmem:[%s3296_s1 + $0x288] ss:$16 sps:$4 sm:$0xff]   ;;  %v2323_v26 = vld [vmem:[%s3296_s1 + $0x2a4] ss:$16 sps:$4 sm:$0xff]   ;;  %v2326_v27 = vld [vmem:[%s3296_s1 + $0x2ac] ss:$16 sps:$4 sm:$0xff]  }
  0x1f   :  { %1260 = vmatpush1.bf16.msra.mxu0 %v2241_v30  ;;  %1432 = vmatpush1.bf16.msra.mxu1 %v2242_v31  ;;  %v2321_v28 = vld [vmem:[%s3296_s1 + $0x2a0] ss:$16 sps:$4 sm:$0xff]   ;;  %v2324_v29 = vld [vmem:[%s3296_s1 + $0x2a8] ss:$16 sps:$4 sm:$0xff]   ;;  %v2329_v30 = vld [vmem:[%s3296_s1 + $0x2c4] ss:$16 sps:$4 sm:$0xff]  }
  0x20   :  { %1261 = vmatprep.subr.bf16.mxu0 %v2243_v32  ;;  %1433 = vmatprep.subr.bf16.mxu1 %v2245_v33  ;;  %v2332_v31 = vld [vmem:[%s3296_s1 + $0x2cc] ss:$16 sps:$4 sm:$0xff]   ;;  %v32_v33 = vld [vmem:[%s3295_s0 + $0x50] sm:$0xff]  ;;  %v2378_v4 = vld [vmem:[%s3296_s1 + $0x3c8] ss:$16 sps:$4 sm:$0xff]  }
  0x21   :  { %v25_v32 = vld [vmem:[%s3295_s0 + $0x18] sm:$0xff]  ;;  %v2345_v47 = vld [vmem:[%s3296_s1 + $0x320] ss:$16 sps:$4 sm:$0xff]   ;;  %v2383_v5 = vld [vmem:[%s3296_s1 + $0x3e4] ss:$16 sps:$4 sm:$0xff]  }
  0x22   :  { %v2350_v46 = vld [vmem:[%s3296_s1 + $0x32c] ss:$16 sps:$4 sm:$0xff]  }
  0x23   :  { %1262 = vmatpush1.bf16.msra.mxu0 %v2247_v34  ;;  %1434 = vmatpush1.bf16.msra.mxu1 %v2248_v35  ;;  %v2327_v34 = vld [vmem:[%s3296_s1 + $0x2c0] ss:$16 sps:$4 sm:$0xff]   ;;  %v2330_v35 = vld [vmem:[%s3296_s1 + $0x2c8] ss:$16 sps:$4 sm:$0xff]   ;;  %v2356_v50 = vld [vmem:[%s3296_s1 + $0x34c] ss:$16 sps:$4 sm:$0xff]  }
  0x24   :  { %1263 = vmatprep.subr.bf16.mxu0 %v2249_v36  ;;  %1435 = vmatprep.subr.bf16.mxu1 %v2251_v37  ;;  %v39_v36 = vpack.c.bf16 %v32_v33, %v25_v32  ;;  %v2335_v37 = vld [vmem:[%s3296_s1 + $0x2e4] ss:$16 sps:$4 sm:$0xff]   ;;  %v2416_v32 = vld [vmem:[%s3296_s1 + $0x48c] ss:$16 sps:$4 sm:$0xff]   ;;  %v2411_v33 = vld [vmem:[%s3296_s1 + $0x480] ss:$16 sps:$4 sm:$0xff]  }
  0x27   :  { %1264 = vmatpush1.bf16.msra.mxu0 %v2253_v38  ;;  %1436 = vmatpush1.bf16.msra.mxu1 %v2254_v39  ;;  %v2338_v38 = vld [vmem:[%s3296_s1 + $0x2ec] ss:$16 sps:$4 sm:$0xff]   ;;  %v2333_v39 = vld [vmem:[%s3296_s1 + $0x2e0] ss:$16 sps:$4 sm:$0xff]  }
  0x28   :  { %1265 = vmatprep.subr.bf16.mxu0 %v2255_v40  ;;  %1437 = vmatprep.subr.bf16.mxu1 %v2257_v41  ;;  %v2336_v40 = vld [vmem:[%s3296_s1 + $0x2e8] ss:$16 sps:$4 sm:$0xff]   ;;  %v2341_v41 = vld [vmem:[%s3296_s1 + $0x304] ss:$16 sps:$4 sm:$0xff]  }
  0x2b   :  { %1266 = vmatpush1.bf16.msra.mxu0 %v2259_v42  ;;  %1438 = vmatpush1.bf16.msra.mxu1 %v2260_v43  ;;  %v2344_v42 = vld [vmem:[%s3296_s1 + $0x30c] ss:$16 sps:$4 sm:$0xff]   ;;  %v2339_v43 = vld [vmem:[%s3296_s1 + $0x300] ss:$16 sps:$4 sm:$0xff]  }
  0x2c   :  { %1267 = vmatprep.subr.bf16.mxu0 %v2261_v44  ;;  %1439 = vmatprep.subr.bf16.mxu1 %v2263_v45  ;;  %v2342_v44 = vld [vmem:[%s3296_s1 + $0x308] ss:$16 sps:$4 sm:$0xff]   ;;  %v2347_v45 = vld [vmem:[%s3296_s1 + $0x324] ss:$16 sps:$4 sm:$0xff]  }
  0x2f   :  { %1268 = vmatpush1.bf16.msra.mxu0 %v2265_v48  ;;  %1440 = vmatpush1.bf16.msra.mxu1 %v2266_v49  ;;  %v2348_v48 = vld [vmem:[%s3296_s1 + $0x328] ss:$16 sps:$4 sm:$0xff]   ;;  %v2353_v49 = vld [vmem:[%s3296_s1 + $0x344] ss:$16 sps:$4 sm:$0xff]  }
  0x30   :  { %1269 = vmatprep.subr.bf16.mxu0 %v2267_v51  ;;  %1441 = vmatprep.subr.bf16.mxu1 %v2269_v52  ;;  %v2351_v51 = vld [vmem:[%s3296_s1 + $0x340] ss:$16 sps:$4 sm:$0xff]   ;;  %v2354_v52 = vld [vmem:[%s3296_s1 + $0x348] ss:$16 sps:$4 sm:$0xff]  }
  0x33   :  { %1270 = vmatpush1.bf16.msra.mxu0 %v2271_v53  ;;  %1442 = vmatpush1.bf16.msra.mxu1 %v2272_v54  ;;  %v2359_v53 = vld [vmem:[%s3296_s1 + $0x364] ss:$16 sps:$4 sm:$0xff]   ;;  %v2362_v54 = vld [vmem:[%s3296_s1 + $0x36c] ss:$16 sps:$4 sm:$0xff]  }
  0x34   :  { %1271 = vmatprep.subr.bf16.mxu0 %v2273_v55  ;;  %1443 = vmatprep.subr.bf16.mxu1 %v2275_v56  ;;  %v2357_v55 = vld [vmem:[%s3296_s1 + $0x360] ss:$16 sps:$4 sm:$0xff]   ;;  %v2360_v56 = vld [vmem:[%s3296_s1 + $0x368] ss:$16 sps:$4 sm:$0xff]  }
  0x37   :  { %1272 = vmatpush1.bf16.msra.mxu0 %v2277_v57  ;;  %1444 = vmatpush1.bf16.msra.mxu1 %v2278_v58  ;;  %v2365_v57 = vld [vmem:[%s3296_s1 + $0x384] ss:$16 sps:$4 sm:$0xff]   ;;  %v2368_v58 = vld [vmem:[%s3296_s1 + $0x38c] ss:$16 sps:$4 sm:$0xff]  }
  0x38   :  { %1273 = vmatprep.subr.bf16.mxu0 %v2279_v59  ;;  %1445 = vmatprep.subr.bf16.mxu1 %v2281_v60  ;;  %v2363_v59 = vld [vmem:[%s3296_s1 + $0x380] ss:$16 sps:$4 sm:$0xff]   ;;  %v2366_v60 = vld [vmem:[%s3296_s1 + $0x388] ss:$16 sps:$4 sm:$0xff]  }
  0x3b   :  { %1274 = vmatpush1.bf16.msra.mxu0 %v2283_v61  ;;  %1446 = vmatpush1.bf16.msra.mxu1 %v2284_v62  ;;  %v2371_v61 = vld [vmem:[%s3296_s1 + $0x3a4] ss:$16 sps:$4 sm:$0xff]   ;;  %v2374_v62 = vld [vmem:[%s3296_s1 + $0x3ac] ss:$16 sps:$4 sm:$0xff]  }
  0x3c   :  { %1275 = vmatprep.subr.bf16.mxu0 %v2285_v63  ;;  %1447 = vmatprep.subr.bf16.mxu1 %v2287_v0  ;;  %v2369_v63 = vld [vmem:[%s3296_s1 + $0x3a0] ss:$16 sps:$4 sm:$0xff]   ;;  %v2372_v0 = vld [vmem:[%s3296_s1 + $0x3a8] ss:$16 sps:$4 sm:$0xff]  }
  0x3f   :  { %1276 = vmatpush1.bf16.msra.mxu0 %v2289_v1  ;;  %1448 = vmatpush1.bf16.msra.mxu1 %v2290_v2  ;;  %v2377_v1 = vld [vmem:[%s3296_s1 + $0x3c4] ss:$16 sps:$4 sm:$0xff]   ;;  %v2380_v2 = vld [vmem:[%s3296_s1 + $0x3cc] ss:$16 sps:$4 sm:$0xff]  }
  0x40   :  { %1288 = vmatprep.subr.bf16.mxu0 %v2293_v3  ;;  %1460 = vmatprep.subr.bf16.mxu1 %v2296_v6  ;;  %v2375_v3 = vld [vmem:[%s3296_s1 + $0x3c0] ss:$16 sps:$4 sm:$0xff]   ;;  %v2386_v6 = vld [vmem:[%s3296_s1 + $0x3ec] ss:$16 sps:$4 sm:$0xff]  }
  0x42   :  { %1278 = vmatmul.mubr.bf16.vlgmr.msra.gmra.mrb[0].mxu0 %v36_v9  ;;  %1450 = vmatmul.mubr.bf16.vlgmr.msra.gmra.mrb[0].mxu1 %v36_v9  ;;  %v2389_v9 = vld [vmem:[%s3296_s1 + $0x404] ss:$16 sps:$4 sm:$0xff]  }
  0x43   :  { %1289 = vmatpush1.bf16.msra.mxu0 %v2291_v7  ;;  %1461 = vmatpush1.bf16.msra.mxu1 %v2294_v8  ;;  %v2381_v7 = vld [vmem:[%s3296_s1 + $0x3e0] ss:$16 sps:$4 sm:$0xff]   ;;  %v2384_v8 = vld [vmem:[%s3296_s1 + $0x3e8] ss:$16 sps:$4 sm:$0xff]  }
  0x44   :  { %1290 = vmatprep.subr.bf16.mxu0 %v2299_v10  ;;  %1462 = vmatprep.subr.bf16.mxu1 %v2302_v11  ;;  %v24_v10 = vld [vmem:[%s3295_s0 + $0x10] sm:$0xff]  ;;  %v31_v11 = vld [vmem:[%s3295_s0 + $0x48] sm:$0xff] }
  0x45   :  { %1320 = vmatprep.mubr.bf16.mxu0 %v39_v36  ;;  %1492 = vmatprep.mubr.bf16.mxu1 %v39_v36  ;;  %v2422_v36 = vld [vmem:[%s3296_s1 + $0x4ac] ss:$16 sps:$4 sm:$0xff]  }
  0x47   :  { %1291 = vmatpush1.bf16.msra.mxu0 %v2297_v12  ;;  %1463 = vmatpush1.bf16.msra.mxu1 %v2300_v13  ;;  %v2392_v12 = vld [vmem:[%s3296_s1 + $0x40c] ss:$16 sps:$4 sm:$0xff]   ;;  %v2387_v13 = vld [vmem:[%s3296_s1 + $0x400] ss:$16 sps:$4 sm:$0xff]  }
  0x48   :  { %1292 = vmatprep.subr.bf16.mxu0 %v2305_v14  ;;  %1464 = vmatprep.subr.bf16.mxu1 %v2308_v15  ;;  %v2390_v14 = vld [vmem:[%s3296_s1 + $0x408] ss:$16 sps:$4 sm:$0xff]   ;;  %v38_v15 = vpack.c.bf16 %v31_v11, %v24_v10 }
  0x4b   :  { %1293 = vmatpush1.bf16.msra.mxu0 %v2303_v16  ;;  %1465 = vmatpush1.bf16.msra.mxu1 %v2306_v17  ;;  %v2395_v16 = vld [vmem:[%s3296_s1 + $0x424] ss:$16 sps:$4 sm:$0xff]   ;;  %v2398_v17 = vld [vmem:[%s3296_s1 + $0x42c] ss:$16 sps:$4 sm:$0xff]  }
  0x4c   :  { %1294 = vmatprep.subr.bf16.mxu0 %v2311_v18  ;;  %1466 = vmatprep.subr.bf16.mxu1 %v2314_v19  ;;  %v27_v18 = vld [vmem:[%s3295_s0 + $0x28] sm:$0xff]  ;;  %v2393_v19 = vld [vmem:[%s3296_s1 + $0x420] ss:$16 sps:$4 sm:$0xff]  }
  0x4f   :  { %1295 = vmatpush1.bf16.msra.mxu0 %v2309_v20  ;;  %1467 = vmatpush1.bf16.msra.mxu1 %v2312_v21  ;;  %v2396_v20 = vld [vmem:[%s3296_s1 + $0x428] ss:$16 sps:$4 sm:$0xff]   ;;  %v34_v21 = vld [vmem:[%s3295_s0 + $0x60] sm:$0xff] }
  0x50   :  { %1296 = vmatprep.subr.bf16.mxu0 %v2317_v22  ;;  %1468 = vmatprep.subr.bf16.mxu1 %v2320_v23  ;;  %v2401_v22 = vld [vmem:[%s3296_s1 + $0x444] ss:$16 sps:$4 sm:$0xff]   ;;  %v41_v23 = vpack.c.bf16 %v34_v21, %v27_v18 }
  0x53   :  { %1297 = vmatpush1.bf16.msra.mxu0 %v2315_v24  ;;  %1469 = vmatpush1.bf16.msra.mxu1 %v2318_v25  ;;  %v2404_v24 = vld [vmem:[%s3296_s1 + $0x44c] ss:$16 sps:$4 sm:$0xff]   ;;  %v2399_v25 = vld [vmem:[%s3296_s1 + $0x440] ss:$16 sps:$4 sm:$0xff]  }
  0x54   :  { %1298 = vmatprep.subr.bf16.mxu0 %v2323_v26  ;;  %1470 = vmatprep.subr.bf16.mxu1 %v2326_v27  ;;  %v2402_v26 = vld [vmem:[%s3296_s1 + $0x448] ss:$16 sps:$4 sm:$0xff]   ;;  %v2407_v27 = vld [vmem:[%s3296_s1 + $0x464] ss:$16 sps:$4 sm:$0xff]  }
  0x57   :  { %1299 = vmatpush1.bf16.msra.mxu0 %v2321_v28  ;;  %1471 = vmatpush1.bf16.msra.mxu1 %v2324_v29  ;;  %v2410_v28 = vld [vmem:[%s3296_s1 + $0x46c] ss:$16 sps:$4 sm:$0xff]   ;;  %v2405_v29 = vld [vmem:[%s3296_s1 + $0x460] ss:$16 sps:$4 sm:$0xff]  }
  0x58   :  { %1300 = vmatprep.subr.bf16.mxu0 %v2329_v30  ;;  %1472 = vmatprep.subr.bf16.mxu1 %v2332_v31  ;;  %v2408_v30 = vld [vmem:[%s3296_s1 + $0x468] ss:$16 sps:$4 sm:$0xff]   ;;  %v2413_v31 = vld [vmem:[%s3296_s1 + $0x484] ss:$16 sps:$4 sm:$0xff]  }
  0x5b   :  { %1301 = vmatpush1.bf16.msra.mxu0 %v2327_v34  ;;  %1473 = vmatpush1.bf16.msra.mxu1 %v2330_v35  ;;  %v2414_v34 = vld [vmem:[%s3296_s1 + $0x488] ss:$16 sps:$4 sm:$0xff]   ;;  %v2419_v35 = vld [vmem:[%s3296_s1 + $0x4a4] ss:$16 sps:$4 sm:$0xff]  }
  0x5c   :  { %1302 = vmatprep.subr.bf16.mxu0 %v2335_v37  ;;  %1474 = vmatprep.subr.bf16.mxu1 %v2338_v38  ;;  %v2417_v37 = vld [vmem:[%s3296_s1 + $0x4a0] ss:$16 sps:$4 sm:$0xff]   ;;  %v2420_v38 = vld [vmem:[%s3296_s1 + $0x4a8] ss:$16 sps:$4 sm:$0xff]  }
  0x5f   :  { %1303 = vmatpush1.bf16.msra.mxu0 %v2333_v39  ;;  %1475 = vmatpush1.bf16.msra.mxu1 %v2336_v40  ;;  %v2425_v39 = vld [vmem:[%s3296_s1 + $0x4c4] ss:$16 sps:$4 sm:$0xff]   ;;  %v2428_v40 = vld [vmem:[%s3296_s1 + $0x4cc] ss:$16 sps:$4 sm:$0xff]  }
  0x60   :  { %1304 = vmatprep.subr.bf16.mxu0 %v2341_v41  ;;  %1476 = vmatprep.subr.bf16.mxu1 %v2344_v42  ;;  %v2423_v41 = vld [vmem:[%s3296_s1 + $0x4c0] ss:$16 sps:$4 sm:$0xff]   ;;  %v2426_v42 = vld [vmem:[%s3296_s1 + $0x4c8] ss:$16 sps:$4 sm:$0xff]  }
  0x63   :  { %1305 = vmatpush1.bf16.msra.mxu0 %v2339_v43  ;;  %1477 = vmatpush1.bf16.msra.mxu1 %v2342_v44  ;;  %v2431_v43 = vld [vmem:[%s3296_s1 + $0x4e4] ss:$16 sps:$4 sm:$0xff]   ;;  %v2434_v44 = vld [vmem:[%s3296_s1 + $0x4ec] ss:$16 sps:$4 sm:$0xff]  }
  0x64   :  { %1306 = vmatprep.subr.bf16.mxu0 %v2347_v45  ;;  %1478 = vmatprep.subr.bf16.mxu1 %v2350_v46  ;;  %v2429_v45 = vld [vmem:[%s3296_s1 + $0x4e0] ss:$16 sps:$4 sm:$0xff]   ;;  %v2432_v46 = vld [vmem:[%s3296_s1 + $0x4e8] ss:$16 sps:$4 sm:$0xff]  }
  0x67   :  { %1307 = vmatpush1.bf16.msra.mxu0 %v2345_v47  ;;  %1479 = vmatpush1.bf16.msra.mxu1 %v2348_v48  ;;  %v2437_v47 = vld [vmem:[%s3296_s1 + $0x504] ss:$16 sps:$4 sm:$0xff]   ;;  %v2440_v48 = vld [vmem:[%s3296_s1 + $0x50c] ss:$16 sps:$4 sm:$0xff]  }
  0x68   :  { %1308 = vmatprep.subr.bf16.mxu0 %v2353_v49  ;;  %1480 = vmatprep.subr.bf16.mxu1 %v2356_v50 }
  0x6b   :  { %1309 = vmatpush1.bf16.msra.mxu0 %v2351_v51  ;;  %1481 = vmatpush1.bf16.msra.mxu1 %v2354_v52 }
  0x6c   :  { %1310 = vmatprep.subr.bf16.mxu0 %v2359_v53  ;;  %1482 = vmatprep.subr.bf16.mxu1 %v2362_v54 }
  0x6f   :  { %1311 = vmatpush1.bf16.msra.mxu0 %v2357_v55  ;;  %1483 = vmatpush1.bf16.msra.mxu1 %v2360_v56 }
  0x70   :  { %1312 = vmatprep.subr.bf16.mxu0 %v2365_v57  ;;  %1484 = vmatprep.subr.bf16.mxu1 %v2368_v58 }
  0x73   :  { %1313 = vmatpush1.bf16.msra.mxu0 %v2363_v59  ;;  %1485 = vmatpush1.bf16.msra.mxu1 %v2366_v60 }
  0x74   :  { %1314 = vmatprep.subr.bf16.mxu0 %v2371_v61  ;;  %1486 = vmatprep.subr.bf16.mxu1 %v2374_v62 }
  0x77   :  { %1315 = vmatpush1.bf16.msra.mxu0 %v2369_v63  ;;  %1487 = vmatpush1.bf16.msra.mxu1 %v2372_v0 }
  0x78   :  { %1316 = vmatprep.subr.bf16.mxu0 %v2377_v1  ;;  %1488 = vmatprep.subr.bf16.mxu1 %v2380_v2 }
  0x7b   :  { %1317 = vmatpush1.bf16.msra.mxu0 %v2375_v3  ;;  %1489 = vmatpush1.bf16.msra.mxu1 %v2378_v4 }
  0x7c   :  { %1318 = vmatprep.subr.bf16.mxu0 %v2383_v5  ;;  %1490 = vmatprep.subr.bf16.mxu1 %v2386_v6 }
  0x7f   :  { %1319 = vmatpush1.bf16.msra.mxu0 %v2381_v7  ;;  %1491 = vmatpush1.bf16.msra.mxu1 %v2384_v8 }
  0x80   :  { %1331 = vmatprep.subr.bf16.mxu0 %v2389_v9  ;;  %1503 = vmatprep.subr.bf16.mxu1 %v2392_v12 }
  0x82   :  { %1321 = vmatmul.mubr.bf16.vlgmr.msra.gmra.mrb[0].mxu0 %v38_v15  ;;  %1493 = vmatmul.mubr.bf16.vlgmr.msra.gmra.mrb[0].mxu1 %v38_v15 }
  0x83   :  { %1332 = vmatpush1.bf16.msra.mxu0 %v2387_v13  ;;  %1504 = vmatpush1.bf16.msra.mxu1 %v2390_v14 }
  0x84   :  { %1333 = vmatprep.subr.bf16.mxu0 %v2395_v16  ;;  %1505 = vmatprep.subr.bf16.mxu1 %v2398_v17 }
  0x85   :  { %1363 = vmatprep.mubr.bf16.mxu0 %v41_v23  ;;  %1535 = vmatprep.mubr.bf16.mxu1 %v41_v23 }
  0x87   :  { %1334 = vmatpush1.bf16.msra.mxu0 %v2393_v19  ;;  %1506 = vmatpush1.bf16.msra.mxu1 %v2396_v20 }
  0x88   :  { %1335 = vmatprep.subr.bf16.mxu0 %v2401_v22  ;;  %1507 = vmatprep.subr.bf16.mxu1 %v2404_v24 }
  0x8b   :  { %1336 = vmatpush1.bf16.msra.mxu0 %v2399_v25  ;;  %1508 = vmatpush1.bf16.msra.mxu1 %v2402_v26 }
  0x8c   :  { %1337 = vmatprep.subr.bf16.mxu0 %v2407_v27  ;;  %1509 = vmatprep.subr.bf16.mxu1 %v2410_v28 }
  0x8f   :  { %1338 = vmatpush1.bf16.msra.mxu0 %v2405_v29  ;;  %1510 = vmatpush1.bf16.msra.mxu1 %v2408_v30 }
  0x90   :  { %1339 = vmatprep.subr.bf16.mxu0 %v2413_v31  ;;  %1511 = vmatprep.subr.bf16.mxu1 %v2416_v32 }
  0x93   :  { %1340 = vmatpush1.bf16.msra.mxu0 %v2411_v33  ;;  %1512 = vmatpush1.bf16.msra.mxu1 %v2414_v34 }
  0x94   :  { %1341 = vmatprep.subr.bf16.mxu0 %v2419_v35  ;;  %1513 = vmatprep.subr.bf16.mxu1 %v2422_v36 }
  0x97   :  { %1342 = vmatpush1.bf16.msra.mxu0 %v2417_v37  ;;  %1514 = vmatpush1.bf16.msra.mxu1 %v2420_v38 }
  0x98   :  { %1343 = vmatprep.subr.bf16.mxu0 %v2425_v39  ;;  %1515 = vmatprep.subr.bf16.mxu1 %v2428_v40 }
  0x9b   :  { %1344 = vmatpush1.bf16.msra.mxu0 %v2423_v41  ;;  %1516 = vmatpush1.bf16.msra.mxu1 %v2426_v42 }
  0x9c   :  { %1345 = vmatprep.subr.bf16.mxu0 %v2431_v43  ;;  %1517 = vmatprep.subr.bf16.mxu1 %v2434_v44 }
  0x9d   :  { %10 = vsyncpa [#allocation3], 0  ;;  %v2435_v49 = vld [vmem:[%s3296_s1 + $0x500] ss:$16 sps:$4 sm:$0xff]   ;;  %v2438_v50 = vld [vmem:[%s3296_s1 + $0x508] ss:$16 sps:$4 sm:$0xff]  }
  0x9e   :  { %v2443_v51 = vld [vmem:[%s3296_s1 + $0x524] ss:$16 sps:$4 sm:$0xff]   ;;  %v2446_v52 = vld [vmem:[%s3296_s1 + $0x52c] ss:$16 sps:$4 sm:$0xff]   ;;  %v2441_v53 = vld [vmem:[%s3296_s1 + $0x520] ss:$16 sps:$4 sm:$0xff]  }
  0x9f   :  { %1346 = vmatpush1.bf16.msra.mxu0 %v2429_v45  ;;  %1518 = vmatpush1.bf16.msra.mxu1 %v2432_v46  ;;  %v2444_v54 = vld [vmem:[%s3296_s1 + $0x528] ss:$16 sps:$4 sm:$0xff]   ;;  %v2449_v55 = vld [vmem:[%s3296_s1 + $0x544] ss:$16 sps:$4 sm:$0xff]   ;;  %v2452_v56 = vld [vmem:[%s3296_s1 + $0x54c] ss:$16 sps:$4 sm:$0xff]  }
  0xa0   :  { %1347 = vmatprep.subr.bf16.mxu0 %v2437_v47  ;;  %1519 = vmatprep.subr.bf16.mxu1 %v2440_v48  ;;  %v2447_v57 = vld [vmem:[%s3296_s1 + $0x540] ss:$16 sps:$4 sm:$0xff]   ;;  %v2450_v58 = vld [vmem:[%s3296_s1 + $0x548] ss:$16 sps:$4 sm:$0xff]   ;;  %v2455_v59 = vld [vmem:[%s3296_s1 + $0x564] ss:$16 sps:$4 sm:$0xff]  }
  0xa1   :  { %v2458_v60 = vld [vmem:[%s3296_s1 + $0x56c] ss:$16 sps:$4 sm:$0xff]   ;;  %v2453_v61 = vld [vmem:[%s3296_s1 + $0x560] ss:$16 sps:$4 sm:$0xff]   ;;  %v2456_v62 = vld [vmem:[%s3296_s1 + $0x568] ss:$16 sps:$4 sm:$0xff]  }
  0xa2   :  { %v2461_v63 = vld [vmem:[%s3296_s1 + $0x584] ss:$16 sps:$4 sm:$0xff]   ;;  %v2464_v0 = vld [vmem:[%s3296_s1 + $0x58c] ss:$16 sps:$4 sm:$0xff]   ;;  %v2459_v1 = vld [vmem:[%s3296_s1 + $0x580] ss:$16 sps:$4 sm:$0xff]  }
  0xa3   :  { %1348 = vmatpush1.bf16.msra.mxu0 %v2435_v49  ;;  %1520 = vmatpush1.bf16.msra.mxu1 %v2438_v50  ;;  %v2462_v2 = vld [vmem:[%s3296_s1 + $0x588] ss:$16 sps:$4 sm:$0xff]   ;;  %v2467_v3 = vld [vmem:[%s3296_s1 + $0x5a4] ss:$16 sps:$4 sm:$0xff]   ;;  %v2470_v4 = vld [vmem:[%s3296_s1 + $0x5ac] ss:$16 sps:$4 sm:$0xff]  }
  0xa4   :  { %1349 = vmatprep.subr.bf16.mxu0 %v2443_v51  ;;  %1521 = vmatprep.subr.bf16.mxu1 %v2446_v52  ;;  %v2465_v5 = vld [vmem:[%s3296_s1 + $0x5a0] ss:$16 sps:$4 sm:$0xff]   ;;  %v2468_v6 = vld [vmem:[%s3296_s1 + $0x5a8] ss:$16 sps:$4 sm:$0xff]   ;;  %v2473_v7 = vld [vmem:[%s3296_s1 + $0x5c4] ss:$16 sps:$4 sm:$0xff]   ;;  %v241_v52 = vlaneseq }
  0xa5   :  { %v2476_v8 = vld [vmem:[%s3296_s1 + $0x5cc] ss:$16 sps:$4 sm:$0xff]   ;;  %v2471_v9 = vld [vmem:[%s3296_s1 + $0x5c0] ss:$16 sps:$4 sm:$0xff]   ;;  %v2474_v10 = vld [vmem:[%s3296_s1 + $0x5c8] ss:$16 sps:$4 sm:$0xff]  }
  0xa6   :  { %v2479_v11 = vld [vmem:[%s3296_s1 + $0x5e4] ss:$16 sps:$4 sm:$0xff]   ;;  %v2482_v12 = vld [vmem:[%s3296_s1 + $0x5ec] ss:$16 sps:$4 sm:$0xff]   ;;  %v2477_v13 = vld [vmem:[%s3296_s1 + $0x5e0] ss:$16 sps:$4 sm:$0xff]  }
  0xa7   :  { %1350 = vmatpush1.bf16.msra.mxu0 %v2441_v53  ;;  %1522 = vmatpush1.bf16.msra.mxu1 %v2444_v54  ;;  %v2480_v14 = vld [vmem:[%s3296_s1 + $0x5e8] ss:$16 sps:$4 sm:$0xff]   ;;  %v26_v15 = vld [vmem:[%s3295_s0 + $0x20] sm:$0xff]  ;;  %v2488_v18 = vld [vmem:[%s3296_s1 + $0x60c] ss:$16 sps:$4 sm:$0xff]   ;;  %v2538_v23 = vmov 0  }
  0xa8   :  { %1351 = vmatprep.subr.bf16.mxu0 %v2449_v55  ;;  %1523 = vmatprep.subr.bf16.mxu1 %v2452_v56  ;;  %v33_v16 = vld [vmem:[%s3295_s0 + $0x58] sm:$0xff]  ;;  %v2485_v17 = vld [vmem:[%s3296_s1 + $0x604] ss:$16 sps:$4 sm:$0xff]   ;;  %v2483_v20 = vld [vmem:[%s3296_s1 + $0x600] ss:$16 sps:$4 sm:$0xff]   ;;  %vm1241_vm0 = vcmask 130048  }
  0xa9   :  { %v40_v19 = vpack.c.bf16 %v33_v16, %v26_v15  ;;  %v2486_v21 = vld [vmem:[%s3296_s1 + $0x608] ss:$16 sps:$4 sm:$0xff]   ;;  %v2490_v22 = vld [vmem:[%s3298_s3 + $0x40] sm:$0xff]   ;;  %v28_v24 = vld [vmem:[%s3295_s0 + $0x30] sm:$0xff]  ;;  %vm1808_vm1 = vcmask 1043456   ;;  %v242_v53 = vshrl.u32 %v241_v52, 7 }
  0xaa   :  { %v35_v25 = vld [vmem:[%s3295_s0 + $0x68] sm:$0xff]  ;;  %v2489_v27 = vld [vmem:[%s3298_s3 + $0x80] sm:$0xff]   ;;  %v2496_v32 = vld [vmem:[%s3298_s3 + $0x50] sm:$0xff]   ;;  %vm1804_vm2 = vcmask 64512   ;;  %s2539_s11 = smov [#allocation2]  }
  0xab   :  { %1352 = vmatpush1.bf16.msra.mxu0 %v2447_v57  ;;  %1524 = vmatpush1.bf16.msra.mxu1 %v2450_v58  ;;  %v42_v26 = vpack.c.bf16 %v35_v25, %v28_v24  ;;  %v2491_v28 = vld [vmem:[%s3298_s3] sm:$0xff]   ;;  %v2493_v29 = vld [vmem:[%s3298_s3 + $0x48] sm:$0xff]   ;;  %v2495_v33 = vld [vmem:[%s3298_s3 + $0x90] sm:$0xff]   ;;  %v243_v54 = vsub.s32 0, %v242_v53  ;;  %v251_v55 = vsub.s32 2, %v242_v53  ;;  %v247_v57 = vsub.s32 1, %v242_v53 }
  0xac   :  { %1353 = vmatprep.subr.bf16.mxu0 %v2455_v59  ;;  %1525 = vmatprep.subr.bf16.mxu1 %v2458_v60  ;;  %v2492_v30 = vld [vmem:[%s3298_s3 + $0x88] sm:$0xff]   ;;  %v2497_v34 = vld [vmem:[%s3298_s3 + $0x10] sm:$0xff]   ;;  %v2499_v35 = vld [vmem:[%s3298_s3 + $0x58] sm:$0xff]   ;;  %v255_v58 = vsub.s32 3, %v242_v53  ;;  %s1901_s12 = sshll.u32 %s2539_s11, 4  ;;  %s1902_s12 = int_to_ptr.vmem [resolvable:$true] %s1901_s12 }
  0xad   :  { %v2494_v31 = vld [vmem:[%s3298_s3 + $0x8] sm:$0xff]   ;;  %v2498_v36 = vld [vmem:[%s3298_s3 + $0x98] sm:$0xff]   ;;  %v2502_v38 = vld [vmem:[%s3298_s3 + $0x60] sm:$0xff]   ;;  %s2514_s1 = scalar_lea.vmem %s1902_s12, 256  ;;  %p2519_p1 = scmp.lt.s32.totalorder %s1902_s12, %s1902_s12 }
  0xae   :  { %v2500_v37 = vld [vmem:[%s3298_s3 + $0x18] sm:$0xff]   ;;  %v2501_v39 = vld [vmem:[%s3298_s3 + $0xa0] sm:$0xff]   ;;  %v2505_v41 = vld [vmem:[%s3298_s3 + $0x68] sm:$0xff]   ;;  %p2515_p0 = scmp.ne.s32.totalorder %s1902_s12, %s2514_s1  ;;  %p2520_p2 = scmp.lt.s32.totalorder %s2514_s1, %s2514_s1 }
  0xaf   :  { %1354 = vmatpush1.bf16.msra.mxu0 %v2453_v61  ;;  %1526 = vmatpush1.bf16.msra.mxu1 %v2456_v62  ;;  %v2503_v40 = vld [vmem:[%s3298_s3 + $0x20] sm:$0xff]   ;;  %v2504_v42 = vld [vmem:[%s3298_s3 + $0xa8] sm:$0xff]   ;;  %v2507_v44 = vld [vmem:[%s3298_s3 + $0xb0] sm:$0xff]  }
  0xb0   :  { %1355 = vmatprep.subr.bf16.mxu0 %v2461_v63  ;;  %1527 = vmatprep.subr.bf16.mxu1 %v2464_v0  ;;  %v2506_v43 = vld [vmem:[%s3298_s3 + $0x28] sm:$0xff]   ;;  %v2508_v45 = vld [vmem:[%s3298_s3 + $0x70] sm:$0xff]   ;;  %v2510_v47 = vld [vmem:[%s3298_s3 + $0xb8] sm:$0xff]   ;;  %p2521_p3 = por %p2520_p2, %p2519_p1 }
  0xb1   :  { %v2509_v46 = vld [vmem:[%s3298_s3 + $0x30] sm:$0xff]   ;;  %v2511_v48 = vld [vmem:[%s3298_s3 + $0x78] sm:$0xff]   ;;  %v2513_v49 = vld [vmem:[%s3298_s3 + $0xc0] ss:$0 sps:$4 sm:$0xff]  }
  0xb2   :  { %v2512_v50 = vld [vmem:[%s3298_s3 + $0x38] sm:$0xff]   ;;  %v1810_v51 = vsel %vm1808_vm1, %v2513_v49, 0  ;;  %v239_v56 = vld [vmem:[%s3297_s2] sm:$0xf]  ;;  %p2522_p4 = pnand %p2521_p3, %p2515_p0 }
  0xb3   :  { %1356 = vmatpush1.bf16.msra.mxu0 %v2459_v1  ;;  %1528 = vmatpush1.bf16.msra.mxu1 %v2462_v2  ;;  %v244_v59 = vrot.slane %v239_v56, %v243_v54  ;;  %v252_v60 = vrot.slane %v239_v56, %v251_v55  ;;  %v248_v61 = vrot.slane %v239_v56, %v247_v57 }
  0xb4   :  { %1357 = vmatprep.subr.bf16.mxu0 %v2467_v3  ;;  %1529 = vmatprep.subr.bf16.mxu1 %v2470_v4  ;;  %v256_v62 = vrot.slane %v239_v56, %v255_v58 }
  0xb7   :  { %1358 = vmatpush1.bf16.msra.mxu0 %v2465_v5  ;;  %1530 = vmatpush1.bf16.msra.mxu1 %v2468_v6 }
  0xb8   :  { %1359 = vmatprep.subr.bf16.mxu0 %v2473_v7  ;;  %1531 = vmatprep.subr.bf16.mxu1 %v2476_v8 }
  0xbb   :  { %1360 = vmatpush1.bf16.msra.mxu0 %v2471_v9  ;;  %1532 = vmatpush1.bf16.msra.mxu1 %v2474_v10 }
  0xbc   :  { %1361 = vmatprep.subr.bf16.mxu0 %v2479_v11  ;;  %1533 = vmatprep.subr.bf16.mxu1 %v2482_v12 }
  0xbf   :  { %1362 = vmatpush1.bf16.msra.mxu0 %v2477_v13  ;;  %1534 = vmatpush1.bf16.msra.mxu1 %v2480_v14 }
  0xc0   :  { %1374 = vmatprep.subr.bf16.mxu0 %v2485_v17  ;;  %1546 = vmatprep.subr.bf16.mxu1 %v2488_v18 }
  0xc2   :  { %1364 = vmatmul.mubr.bf16.vlgmr.msra.gmra.mrb[0].mxu0 %v40_v19  ;;  %1536 = vmatmul.mubr.bf16.vlgmr.msra.gmra.mrb[0].mxu1 %v40_v19 }
  0xc3   :  { %1375 = vmatpush1.bf16.msra.mxu0 %v2483_v20  ;;  %1547 = vmatpush1.bf16.msra.mxu1 %v2486_v21 }
  0xc4   :  { %1406 = vmatprep.mubr.bf16.mxu0 %v2538_v23  ;;  %1578 = vmatprep.mubr.bf16.mxu1 %v2538_v23 }
  0xc5   :  { %1853 = vmatprep.subr.bf16.mxu1 %v2538_v23  ;;  %2137 = vmatprep.subr.bf16.mxu0 %v2490_v22 }
  0xce   :  { %2108 = vmatmul.mubr.msk.bf16.vlgmr.msra.gmra.mrb[0].mxu0 %vm1241_vm0, %v42_v26  ;;  %2109 = vmatmul.mubr.msk.bf16.vlgmr.msra.gmra.mrb[0].mxu1 %vm1241_vm0, %v42_v26 }
  0xcf   :  { %1854 = vmatpush1.bf16.msra.mxu1 %v2489_v27  ;;  %2138 = vmatpush3.bf16.msra.mxu0 %v2491_v28 }
  0xd0   :  { %1855 = vmatprep.subr.bf16.mxu1 %v2538_v23  ;;  %2139 = vmatprep.subr.bf16.mxu0 %v2493_v29  ;;  %v2110_v29 = vld [vmem:[%s3299_s4] ss:$0 sm:$0xff] }
  0xd3   :  { %1856 = vmatpush1.bf16.msra.mxu1 %v2492_v30  ;;  %2140 = vmatpush3.bf16.msra.mxu0 %v2494_v31 }
  0xd4   :  { %1857 = vmatprep.subr.bf16.mxu1 %v2538_v23  ;;  %2141 = vmatprep.subr.bf16.mxu0 %v2496_v32 }
  0xd7   :  { %1858 = vmatpush1.bf16.msra.mxu1 %v2495_v33  ;;  %2142 = vmatpush3.bf16.msra.mxu0 %v2497_v34 }
  0xd8   :  { %1859 = vmatprep.subr.bf16.mxu1 %v2538_v23  ;;  %2143 = vmatprep.subr.bf16.mxu0 %v2499_v35 }
  0xdb   :  { %1860 = vmatpush1.bf16.msra.mxu1 %v2498_v36  ;;  %2144 = vmatpush3.bf16.msra.mxu0 %v2500_v37 }
  0xdc   :  { %1861 = vmatprep.subr.bf16.mxu1 %v2538_v23  ;;  %2145 = vmatprep.subr.bf16.mxu0 %v2502_v38 }
  0xdf   :  { %1862 = vmatpush1.bf16.msra.mxu1 %v2501_v39  ;;  %2146 = vmatpush3.bf16.msra.mxu0 %v2503_v40 }
  0xe0   :  { %1863 = vmatprep.subr.bf16.mxu1 %v2538_v23  ;;  %2147 = vmatprep.subr.bf16.mxu0 %v2505_v41 }
  0xe3   :  { %1864 = vmatpush1.bf16.msra.mxu1 %v2504_v42  ;;  %2148 = vmatpush3.bf16.msra.mxu0 %v2506_v43 }
  0xe4   :  { %1865 = vmatprep.subr.bf16.mxu1 %v2538_v23  ;;  %2149 = vmatprep.subr.bf16.mxu0 %v2508_v45 }
  0xe7   :  { %1866 = vmatpush1.bf16.msra.mxu1 %v2507_v44  ;;  %2150 = vmatpush3.bf16.msra.mxu0 %v2509_v46 }
  0xe8   :  { %1867 = vmatprep.subr.bf16.mxu1 %v2538_v23  ;;  %2151 = vmatprep.subr.bf16.mxu0 %v2511_v48 }
  0xeb   :  { %1868 = vmatpush1.bf16.msra.mxu1 %v2510_v47  ;;  %2152 = vmatpush3.bf16.msra.mxu0 %v2512_v50 }
  0xec   :  { %1869 = vmatprep.subr.bf16.mxu1 %v2538_v23 }
  0xef   :  { %1870 = vmatpush1.bf16.msra.mxu1 %v1810_v51 }
 0x1a1   :  { %v1408_v63 = vpop.f32.mrb[0].mxu0  ;;  %v1580_v0 = vpop.f32.mrb[0].mxu1 }
 0x1a2   :  { %v2159_v1 = vadd.f32 %v1408_v63, %v244_v59  ;;  %v2163_v2 = vadd.f32 %v1580_v0, %v252_v60  ;;  %v1410_v3 = vpop.f32.mrb[1].mxu0  ;;  %v1582_v4 = vpop.f32.mrb[1].mxu1 }
 0x1a3   :  { %v2160_v5 = vadd.f32 %v1410_v3, %v248_v61  ;;  %v2164_v6 = vadd.f32 %v1582_v4, %v256_v62  ;;  %v1412_v7 = vpop.f32.mrb[2].mxu0  ;;  %v1584_v8 = vpop.f32.mrb[2].mxu1 }
 0x1a4   :  { %v2161_v9 = vadd.f32 %v1412_v7, %v244_v59  ;;  %v2165_v10 = vadd.f32 %v1584_v8, %v252_v60  ;;  %v1414_v11 = vpop.f32.mrb[3].mxu0  ;;  %v1586_v12 = vpop.f32.mrb[3].mxu1  ;;  %v1589_v15 = vmax.f32 %v2159_v1, 0.0  ;;  %v1591_v16 = vmax.f32 %v2163_v2, 0.0 }
 0x1a5   :  { %v2162_v13 = vadd.f32 %v1414_v11, %v248_v61  ;;  %v2166_v14 = vadd.f32 %v1586_v12, %v256_v62  ;;  %v1590_v19 = vmax.f32 %v2160_v5, 0.0  ;;  %v1592_v20 = vmax.f32 %v2164_v6, 0.0 }
 0x1a6   :  { %v1593_v17 = vmax.f32 %v2161_v9, 0.0  ;;  %v1595_v18 = vmax.f32 %v2165_v10, 0.0 }
 0x1a7   :  { %v1594_v21 = vmax.f32 %v2162_v13, 0.0  ;;  %v1596_v22 = vmax.f32 %v2166_v14, 0.0 }
 0x1a8   :  { %v1597_v23 = vpack.c.bf16 %v1593_v17, %v1589_v15  ;;  %v1599_v24 = vpack.c.bf16 %v1595_v18, %v1591_v16 }
 0x1a9   :  { %v1598_v25 = vpack.c.bf16 %v1594_v21, %v1590_v19  ;;  %v1600_v26 = vpack.c.bf16 %v1596_v22, %v1592_v20 }
 0x1ab   :  { %1844 = vmatprep.mubr.bf16.mxu0 %v1598_v25  ;;  %2136 = vmatprep.mubr.msk.bf16.mxu1 %vm1804_vm2, %v1600_v26 }
 0x1ac   :  { %1845 = vmatmul.mubr.bf16.vlgmr.msra.gmra.mrb[4].mxu0 %v1597_v23  ;;  %1886 = vmatmul.mubr.bf16.vlgmr.msra.gmra.mrb[4].mxu1 %v1599_v24 }
 0x27f   :  { %v2153_v27 = vpop.f32.mrb[4].mxu0  ;;  %v1887_v28 = vpop.f32.mrb[4].mxu1 }
 0x280   :  { %v2154_v30 = vpop.f32.mrb[5].mxu0  ;;  %v1889_v31 = vpop.f32.mrb[5].mxu1 }
 0x281   :  { %v2155_v32 = vadd.f32 %v2154_v30, %v2153_v27  ;;  %v2156_v33 = vpop.f32.mrb[6].mxu0  ;;  %v1890_v34 = vpop.f32.mrb[6].mxu1 }
 0x282   :  { %v2157_v35 = vpop.f32.mrb[7].mxu0  ;;  %v1892_v36 = vpop.f32.mrb[7].mxu1 }
 0x283   :  { %v1847_v37 = vadd.f32 %v2155_v32, %v2110_v29  ;;  %v2158_v38 = vadd.f32 %v2157_v35, %v2156_v33 }
 0x285   :  { %v1888_v39 = vadd.f32 %v1887_v28, %v1847_v37  ;;  %v1850_v40 = vadd.f32 %v2158_v38, %v2110_v29 }
 0x287   :  { %1894 = vst [vmem:[#allocation2] sm:$0xff] %v1888_v39  ;;  %v1891_v41 = vadd.f32 %v1890_v34, %v1850_v40 }
 0x289   :  { %1895 = vst [vmem:[#allocation2 + $0x8] sm:$0xff] %v1891_v41 }
 0x28a   :  { %2525 = shalt.err (!%p2522_p4)
}
 0x28b   :  { %s2526_s14 = scalar_lea.hbm %s3300_s5, 256 }
 0x28c   :  { %p2527_p5 = scmp.ne.s32.totalorder %s3300_s5, %s2526_s14  ;;  %p2530_p6 = scmp.lt.u32.totalorder %s2526_s14, %s3300_s5 }
 0x28e   :  { %p2532_p7 = pnand %p2530_p6, %p2527_p5 }
 0x290   :  { %2535 = shalt.err (!%p2532_p7)
}
 0x291   :  { %s2540_s19 = smov 128   ;;  %s2541_s20 = smov 8  }
 0x292   :  { %1907 = dma.vmem_to_hbm [thread:$0]  %s1902_s12, 256, %s3300_s5, [#allocation3], %s2540_s19, %s2540_s19, %s2541_s20  }
 0x293   :  { %2536 = dma.done.wait [#allocation3], 256  }
 0x294   :  { %2537 = vsyncadd [#allocation3], 4294967040 }
 0x295   :  { %1911 = vsyncpa [#allocation3], 1 }

</bundles_post_ra>
